<compile_context>
chip_gen: v7x
topology: tpu7x:2x2x1
jax: 0.10.0
libtpu: 0.0.40
codegen_flags: <defaults>
</compile_context>

<pallas_src>
import numpy as np
import jax
import jax.numpy as jnp
from jax.experimental import pallas as pl
from jax.experimental.pallas import tpu as pltpu

OC, KH, KW = 4, 4, 4  # out channels, kernel height, kernel width


def _conv_relu_kernel(x_ref, conv_ref, relu_ref):
    # x_ref   : VMEM, (N, 1, H, W)  -- whole batch, single input channel
    # conv_ref: VMEM, (N, OC, H_out, W_out)
    # relu_ref: VMEM, (N, OC, H_out, W_out)
    n = conv_ref.shape[0]
    h_out = conv_ref.shape[2]
    w_out = conv_ref.shape[3]

    for b in range(n):  # tiny static batch (N=2); see TODO for large N
        # acc1 = x (*) filter_1   (sign depends only on kw: -,-,+,+)
        # acc3 = x (*) filter_3   (sign depends only on kh: -,-,+,+)
        # channels: 0 -> acc1, 1 -> -acc1, 2 -> acc3, 3 -> -acc3
        acc1 = jnp.zeros((h_out, w_out), jnp.float32)
        acc3 = jnp.zeros((h_out, w_out), jnp.float32)
        for kh in range(KH):
            for kw in range(KW):
                # Shifted window sourced directly from the ref; each of the 16
                # windows is loaded exactly once and shared by both accumulators.
                win = x_ref[b, 0, kh:kh + h_out, kw:kw + w_out]
                acc1 = (acc1 + win) if kw >= 2 else (acc1 - win)
                acc3 = (acc3 + win) if kh >= 2 else (acc3 - win)

        neg1 = -acc1
        neg3 = -acc3

        # Per-plane stores (no stacking / relayout); interleaves with compute.
        conv_ref[b, 0] = acc1
        conv_ref[b, 1] = neg1
        conv_ref[b, 2] = acc3
        conv_ref[b, 3] = neg3
        relu_ref[b, 0] = jnp.maximum(acc1, 0.0)
        relu_ref[b, 1] = jnp.maximum(neg1, 0.0)
        relu_ref[b, 2] = jnp.maximum(acc3, 0.0)
        relu_ref[b, 3] = jnp.maximum(neg3, 0.0)


def net_forward(x):
    """x: (N, 1, H, W) f32.  Returns (conv_x, activated_x),
    both (N, OC, H-KH+1, W-KW+1), using the fixed Net edge-detector weights."""
    n, cin, h, w = x.shape
    assert cin == 1
    h_out, w_out = h - KH + 1, w - KW + 1

    out_shape = (
        jax.ShapeDtypeStruct((n, OC, h_out, w_out), jnp.float32),
        jax.ShapeDtypeStruct((n, OC, h_out, w_out), jnp.float32),
    )

    # Single grid step: the whole batch (+ both outputs) is a few KiB and fits
    # VMEM trivially, so no per-image pipelining overhead.
    grid_spec = pl.GridSpec(
        grid=(1,),
        in_specs=[
            pl.BlockSpec((n, 1, h, w), lambda i: (0, 0, 0, 0)),
        ],
        out_specs=[
            pl.BlockSpec((n, OC, h_out, w_out), lambda i: (0, 0, 0, 0)),
            pl.BlockSpec((n, OC, h_out, w_out), lambda i: (0, 0, 0, 0)),
        ],
    )

    return pl.pallas_call(
        _conv_relu_kernel,
        out_shape=out_shape,
        grid_spec=grid_spec,
        compiler_params=pltpu.CompilerParams(
            dimension_semantics=("arbitrary",)),
    )(x)


def make_weights():
    # Deterministic weights exactly as in the PyTorch script (used only for the
    # reference check; the kernel has them baked in as +-1 constants).
    filter_vals = np.array(
        [[-1, -1, 1, 1],
         [-1, -1, 1, 1],
         [-1, -1, 1, 1],
         [-1, -1, 1, 1]], dtype=np.float32)
    filter_1 = filter_vals
    filter_2 = -filter_1
    filter_3 = filter_1.T
    filter_4 = -filter_3
    filters = np.stack([filter_1, filter_2, filter_3, filter_4], axis=0)  # (4,4,4)
    return jnp.asarray(filters[:, None, :, :])  # (OC, 1, KH, KW)


if __name__ == "__main__":
    key = jax.random.PRNGKey(0)
    N, C, H, W = 2, 1, 16, 16
    x = jax.random.normal(key, (N, C, H, W), dtype=jnp.float32)
    weight = make_weights()

    conv_x, activated_x = net_forward(x)
    conv_x = jax.block_until_ready(conv_x)
    activated_x = jax.block_until_ready(activated_x)

    # Reference check against XLA conv (cross-correlation, valid padding).
    ref = jax.lax.conv_general_dilated(
        x, weight, window_strides=(1, 1), padding="VALID",
        dimension_numbers=("NCHW", "OIHW", "NCHW"))
    assert conv_x.shape == (N, OC, H - KH + 1, W - KW + 1)
    assert jnp.allclose(conv_x, ref, atol=1e-4)
    assert jnp.allclose(activated_x, jnp.maximum(ref, 0.0), atol=1e-4)

    print("KERNEL_OK")
</pallas_src>

<mosaic_0001>
module attributes {stable_mosaic.version = 11 : i64} {
  func.func @_conv_relu_kernel(%arg0: i32, %arg1: memref<2x1x16x16xf32, #tpu.memory_space<vmem>>, %arg2: memref<2x4x13x13xf32, #tpu.memory_space<vmem>>, %arg3: memref<2x4x13x13xf32, #tpu.memory_space<vmem>>) attributes {dimension_semantics = [#tpu.dimension_semantics<arbitrary>], iteration_bounds = array<i64: 1>, scalar_prefetch = 0 : i64, scratch_operands = 0 : i64, tpu.core_type = #tpu.core_type<tc>, window_params = [{pipeline_mode = #tpu.pipeline_mode<synchronous>, transform_indices = @transform_0, window_bounds = array<i64: 2, 1, 16, 16>}, {pipeline_mode = #tpu.pipeline_mode<synchronous>, transform_indices = @transform_1, window_bounds = array<i64: 2, 4, 13, 13>}, {pipeline_mode = #tpu.pipeline_mode<synchronous>, transform_indices = @transform_2, window_bounds = array<i64: 2, 4, 13, 13>}]} {
    %cst = arith.constant 0.000000e+00 : f32
    %0 = vector.broadcast %cst : f32 to vector<13x13xf32>
    %cst_0 = arith.constant 0.000000e+00 : f32
    %1 = vector.broadcast %cst_0 : f32 to vector<13x13xf32>
    %c0 = arith.constant 0 : index
    %c0_1 = arith.constant 0 : index
    %c0_2 = arith.constant 0 : index
    %c0_3 = arith.constant 0 : index
    %2 = vector.load %arg1[%c0, %c0_1, %c0_2, %c0_3] : memref<2x1x16x16xf32, #tpu.memory_space<vmem>>, vector<1x1x13x13xf32>
    %3 = vector.shape_cast %2 : vector<1x1x13x13xf32> to vector<13x13xf32>
    %4 = arith.subf %0, %3 : vector<13x13xf32>
    %5 = arith.subf %1, %3 : vector<13x13xf32>
    %c0_4 = arith.constant 0 : index
    %c0_5 = arith.constant 0 : index
    %c0_6 = arith.constant 0 : index
    %c1 = arith.constant 1 : index
    %6 = vector.load %arg1[%c0_4, %c0_5, %c0_6, %c1] : memref<2x1x16x16xf32, #tpu.memory_space<vmem>>, vector<1x1x13x13xf32>
    %7 = vector.shape_cast %6 : vector<1x1x13x13xf32> to vector<13x13xf32>
    %8 = arith.subf %4, %7 : vector<13x13xf32>
    %9 = arith.subf %5, %7 : vector<13x13xf32>
    %c0_7 = arith.constant 0 : index
    %c0_8 = arith.constant 0 : index
    %c0_9 = arith.constant 0 : index
    %c2 = arith.constant 2 : index
    %10 = vector.load %arg1[%c0_7, %c0_8, %c0_9, %c2] : memref<2x1x16x16xf32, #tpu.memory_space<vmem>>, vector<1x1x13x13xf32>
    %11 = vector.shape_cast %10 : vector<1x1x13x13xf32> to vector<13x13xf32>
    %12 = arith.addf %8, %11 : vector<13x13xf32>
    %13 = arith.subf %9, %11 : vector<13x13xf32>
    %c0_10 = arith.constant 0 : index
    %c0_11 = arith.constant 0 : index
    %c0_12 = arith.constant 0 : index
    %c3 = arith.constant 3 : index
    %14 = vector.load %arg1[%c0_10, %c0_11, %c0_12, %c3] : memref<2x1x16x16xf32, #tpu.memory_space<vmem>>, vector<1x1x13x13xf32>
    %15 = vector.shape_cast %14 : vector<1x1x13x13xf32> to vector<13x13xf32>
    %16 = arith.addf %12, %15 : vector<13x13xf32>
    %17 = arith.subf %13, %15 : vector<13x13xf32>
    %c0_13 = arith.constant 0 : index
    %c0_14 = arith.constant 0 : index
    %c1_15 = arith.constant 1 : index
    %c0_16 = arith.constant 0 : index
    %18 = vector.load %arg1[%c0_13, %c0_14, %c1_15, %c0_16] : memref<2x1x16x16xf32, #tpu.memory_space<vmem>>, vector<1x1x13x13xf32>
    %19 = vector.shape_cast %18 : vector<1x1x13x13xf32> to vector<13x13xf32>
    %20 = arith.subf %16, %19 : vector<13x13xf32>
    %21 = arith.subf %17, %19 : vector<13x13xf32>
    %c0_17 = arith.constant 0 : index
    %c0_18 = arith.constant 0 : index
    %c1_19 = arith.constant 1 : index
    %c1_20 = arith.constant 1 : index
    %22 = vector.load %arg1[%c0_17, %c0_18, %c1_19, %c1_20] : memref<2x1x16x16xf32, #tpu.memory_space<vmem>>, vector<1x1x13x13xf32>
    %23 = vector.shape_cast %22 : vector<1x1x13x13xf32> to vector<13x13xf32>
    %24 = arith.subf %20, %23 : vector<13x13xf32>
    %25 = arith.subf %21, %23 : vector<13x13xf32>
    %c0_21 = arith.constant 0 : index
    %c0_22 = arith.constant 0 : index
    %c1_23 = arith.constant 1 : index
    %c2_24 = arith.constant 2 : index
    %26 = vector.load %arg1[%c0_21, %c0_22, %c1_23, %c2_24] : memref<2x1x16x16xf32, #tpu.memory_space<vmem>>, vector<1x1x13x13xf32>
    %27 = vector.shape_cast %26 : vector<1x1x13x13xf32> to vector<13x13xf32>
    %28 = arith.addf %24, %27 : vector<13x13xf32>
    %29 = arith.subf %25, %27 : vector<13x13xf32>
    %c0_25 = arith.constant 0 : index
    %c0_26 = arith.constant 0 : index
    %c1_27 = arith.constant 1 : index
    %c3_28 = arith.constant 3 : index
    %30 = vector.load %arg1[%c0_25, %c0_26, %c1_27, %c3_28] : memref<2x1x16x16xf32, #tpu.memory_space<vmem>>, vector<1x1x13x13xf32>
    %31 = vector.shape_cast %30 : vector<1x1x13x13xf32> to vector<13x13xf32>
    %32 = arith.addf %28, %31 : vector<13x13xf32>
    %33 = arith.subf %29, %31 : vector<13x13xf32>
    %c0_29 = arith.constant 0 : index
    %c0_30 = arith.constant 0 : index
    %c2_31 = arith.constant 2 : index
    %c0_32 = arith.constant 0 : index
    %34 = vector.load %arg1[%c0_29, %c0_30, %c2_31, %c0_32] : memref<2x1x16x16xf32, #tpu.memory_space<vmem>>, vector<1x1x13x13xf32>
    %35 = vector.shape_cast %34 : vector<1x1x13x13xf32> to vector<13x13xf32>
    %36 = arith.subf %32, %35 : vector<13x13xf32>
    %37 = arith.addf %33, %35 : vector<13x13xf32>
    %c0_33 = arith.constant 0 : index
    %c0_34 = arith.constant 0 : index
    %c2_35 = arith.constant 2 : index
    %c1_36 = arith.constant 1 : index
    %38 = vector.load %arg1[%c0_33, %c0_34, %c2_35, %c1_36] : memref<2x1x16x16xf32, #tpu.memory_space<vmem>>, vector<1x1x13x13xf32>
    %39 = vector.shape_cast %38 : vector<1x1x13x13xf32> to vector<13x13xf32>
    %40 = arith.subf %36, %39 : vector<13x13xf32>
    %41 = arith.addf %37, %39 : vector<13x13xf32>
    %c0_37 = arith.constant 0 : index
    %c0_38 = arith.constant 0 : index
    %c2_39 = arith.constant 2 : index
    %c2_40 = arith.constant 2 : index
    %42 = vector.load %arg1[%c0_37, %c0_38, %c2_39, %c2_40] : memref<2x1x16x16xf32, #tpu.memory_space<vmem>>, vector<1x1x13x13xf32>
    %43 = vector.shape_cast %42 : vector<1x1x13x13xf32> to vector<13x13xf32>
    %44 = arith.addf %40, %43 : vector<13x13xf32>
    %45 = arith.addf %41, %43 : vector<13x13xf32>
    %c0_41 = arith.constant 0 : index
    %c0_42 = arith.constant 0 : index
    %c2_43 = arith.constant 2 : index
    %c3_44 = arith.constant 3 : index
    %46 = vector.load %arg1[%c0_41, %c0_42, %c2_43, %c3_44] : memref<2x1x16x16xf32, #tpu.memory_space<vmem>>, vector<1x1x13x13xf32>
    %47 = vector.shape_cast %46 : vector<1x1x13x13xf32> to vector<13x13xf32>
    %48 = arith.addf %44, %47 : vector<13x13xf32>
    %49 = arith.addf %45, %47 : vector<13x13xf32>
    %c0_45 = arith.constant 0 : index
    %c0_46 = arith.constant 0 : index
    %c3_47 = arith.constant 3 : index
    %c0_48 = arith.constant 0 : index
    %50 = vector.load %arg1[%c0_45, %c0_46, %c3_47, %c0_48] : memref<2x1x16x16xf32, #tpu.memory_space<vmem>>, vector<1x1x13x13xf32>
    %51 = vector.shape_cast %50 : vector<1x1x13x13xf32> to vector<13x13xf32>
    %52 = arith.subf %48, %51 : vector<13x13xf32>
    %53 = arith.addf %49, %51 : vector<13x13xf32>
    %c0_49 = arith.constant 0 : index
    %c0_50 = arith.constant 0 : index
    %c3_51 = arith.constant 3 : index
    %c1_52 = arith.constant 1 : index
    %54 = vector.load %arg1[%c0_49, %c0_50, %c3_51, %c1_52] : memref<2x1x16x16xf32, #tpu.memory_space<vmem>>, vector<1x1x13x13xf32>
    %55 = vector.shape_cast %54 : vector<1x1x13x13xf32> to vector<13x13xf32>
    %56 = arith.subf %52, %55 : vector<13x13xf32>
    %57 = arith.addf %53, %55 : vector<13x13xf32>
    %c0_53 = arith.constant 0 : index
    %c0_54 = arith.constant 0 : index
    %c3_55 = arith.constant 3 : index
    %c2_56 = arith.constant 2 : index
    %58 = vector.load %arg1[%c0_53, %c0_54, %c3_55, %c2_56] : memref<2x1x16x16xf32, #tpu.memory_space<vmem>>, vector<1x1x13x13xf32>
    %59 = vector.shape_cast %58 : vector<1x1x13x13xf32> to vector<13x13xf32>
    %60 = arith.addf %56, %59 : vector<13x13xf32>
    %61 = arith.addf %57, %59 : vector<13x13xf32>
    %c0_57 = arith.constant 0 : index
    %c0_58 = arith.constant 0 : index
    %c3_59 = arith.constant 3 : index
    %c3_60 = arith.constant 3 : index
    %62 = vector.load %arg1[%c0_57, %c0_58, %c3_59, %c3_60] : memref<2x1x16x16xf32, #tpu.memory_space<vmem>>, vector<1x1x13x13xf32>
    %63 = vector.shape_cast %62 : vector<1x1x13x13xf32> to vector<13x13xf32>
    %64 = arith.addf %60, %63 : vector<13x13xf32>
    %65 = arith.addf %61, %63 : vector<13x13xf32>
    %cst_61 = arith.constant 0.000000e+00 : f32
    %66 = vector.broadcast %cst_61 : f32 to vector<13x13xf32>
    %67 = arith.subf %66, %64 : vector<13x13xf32>
    %cst_62 = arith.constant 0.000000e+00 : f32
    %68 = vector.broadcast %cst_62 : f32 to vector<13x13xf32>
    %69 = arith.subf %68, %65 : vector<13x13xf32>
    %c0_63 = arith.constant 0 : index
    %c0_64 = arith.constant 0 : index
    %c0_65 = arith.constant 0 : index
    %c0_66 = arith.constant 0 : index
    %70 = vector.load %arg2[%c0_63, %c0_64, %c0_65, %c0_66] : memref<2x4x13x13xf32, #tpu.memory_space<vmem>>, vector<1x1x13x13xf32>
    %71 = vector.shape_cast %70 : vector<1x1x13x13xf32> to vector<13x13xf32>
    %72 = vector.shape_cast %64 : vector<13x13xf32> to vector<1x1x13x13xf32>
    tpu.vector_store %arg2[%c0_63, %c0_64, %c0_65, %c0_66], %72 {strides = array<i32>} : memref<2x4x13x13xf32, #tpu.memory_space<vmem>>, vector<1x1x13x13xf32>,
    %c0_67 = arith.constant 0 : index
    %c1_68 = arith.constant 1 : index
    %c0_69 = arith.constant 0 : index
    %c0_70 = arith.constant 0 : index
    %73 = vector.load %arg2[%c0_67, %c1_68, %c0_69, %c0_70] : memref<2x4x13x13xf32, #tpu.memory_space<vmem>>, vector<1x1x13x13xf32>
    %74 = vector.shape_cast %73 : vector<1x1x13x13xf32> to vector<13x13xf32>
    %75 = vector.shape_cast %67 : vector<13x13xf32> to vector<1x1x13x13xf32>
    tpu.vector_store %arg2[%c0_67, %c1_68, %c0_69, %c0_70], %75 {strides = array<i32>} : memref<2x4x13x13xf32, #tpu.memory_space<vmem>>, vector<1x1x13x13xf32>,
    %c0_71 = arith.constant 0 : index
    %c2_72 = arith.constant 2 : index
    %c0_73 = arith.constant 0 : index
    %c0_74 = arith.constant 0 : index
    %76 = vector.load %arg2[%c0_71, %c2_72, %c0_73, %c0_74] : memref<2x4x13x13xf32, #tpu.memory_space<vmem>>, vector<1x1x13x13xf32>
    %77 = vector.shape_cast %76 : vector<1x1x13x13xf32> to vector<13x13xf32>
    %78 = vector.shape_cast %65 : vector<13x13xf32> to vector<1x1x13x13xf32>
    tpu.vector_store %arg2[%c0_71, %c2_72, %c0_73, %c0_74], %78 {strides = array<i32>} : memref<2x4x13x13xf32, #tpu.memory_space<vmem>>, vector<1x1x13x13xf32>,
    %c0_75 = arith.constant 0 : index
    %c3_76 = arith.constant 3 : index
    %c0_77 = arith.constant 0 : index
    %c0_78 = arith.constant 0 : index
    %79 = vector.load %arg2[%c0_75, %c3_76, %c0_77, %c0_78] : memref<2x4x13x13xf32, #tpu.memory_space<vmem>>, vector<1x1x13x13xf32>
    %80 = vector.shape_cast %79 : vector<1x1x13x13xf32> to vector<13x13xf32>
    %81 = vector.shape_cast %69 : vector<13x13xf32> to vector<1x1x13x13xf32>
    tpu.vector_store %arg2[%c0_75, %c3_76, %c0_77, %c0_78], %81 {strides = array<i32>} : memref<2x4x13x13xf32, #tpu.memory_space<vmem>>, vector<1x1x13x13xf32>,
    %cst_79 = arith.constant 0.000000e+00 : f32
    %82 = vector.broadcast %cst_79 : f32 to vector<13x13xf32>
    %83 = arith.maximumf %64, %82 : vector<13x13xf32>
    %c0_80 = arith.constant 0 : index
    %c0_81 = arith.constant 0 : index
    %c0_82 = arith.constant 0 : index
    %c0_83 = arith.constant 0 : index
    %84 = vector.load %arg3[%c0_80, %c0_81, %c0_82, %c0_83] : memref<2x4x13x13xf32, #tpu.memory_space<vmem>>, vector<1x1x13x13xf32>
    %85 = vector.shape_cast %84 : vector<1x1x13x13xf32> to vector<13x13xf32>
    %86 = vector.shape_cast %83 : vector<13x13xf32> to vector<1x1x13x13xf32>
    tpu.vector_store %arg3[%c0_80, %c0_81, %c0_82, %c0_83], %86 {strides = array<i32>} : memref<2x4x13x13xf32, #tpu.memory_space<vmem>>, vector<1x1x13x13xf32>,
    %cst_84 = arith.constant 0.000000e+00 : f32
    %87 = vector.broadcast %cst_84 : f32 to vector<13x13xf32>
    %88 = arith.maximumf %67, %87 : vector<13x13xf32>
    %c0_85 = arith.constant 0 : index
    %c1_86 = arith.constant 1 : index
    %c0_87 = arith.constant 0 : index
    %c0_88 = arith.constant 0 : index
    %89 = vector.load %arg3[%c0_85, %c1_86, %c0_87, %c0_88] : memref<2x4x13x13xf32, #tpu.memory_space<vmem>>, vector<1x1x13x13xf32>
    %90 = vector.shape_cast %89 : vector<1x1x13x13xf32> to vector<13x13xf32>
    %91 = vector.shape_cast %88 : vector<13x13xf32> to vector<1x1x13x13xf32>
    tpu.vector_store %arg3[%c0_85, %c1_86, %c0_87, %c0_88], %91 {strides = array<i32>} : memref<2x4x13x13xf32, #tpu.memory_space<vmem>>, vector<1x1x13x13xf32>,
    %cst_89 = arith.constant 0.000000e+00 : f32
    %92 = vector.broadcast %cst_89 : f32 to vector<13x13xf32>
    %93 = arith.maximumf %65, %92 : vector<13x13xf32>
    %c0_90 = arith.constant 0 : index
    %c2_91 = arith.constant 2 : index
    %c0_92 = arith.constant 0 : index
    %c0_93 = arith.constant 0 : index
    %94 = vector.load %arg3[%c0_90, %c2_91, %c0_92, %c0_93] : memref<2x4x13x13xf32, #tpu.memory_space<vmem>>, vector<1x1x13x13xf32>
    %95 = vector.shape_cast %94 : vector<1x1x13x13xf32> to vector<13x13xf32>
    %96 = vector.shape_cast %93 : vector<13x13xf32> to vector<1x1x13x13xf32>
    tpu.vector_store %arg3[%c0_90, %c2_91, %c0_92, %c0_93], %96 {strides = array<i32>} : memref<2x4x13x13xf32, #tpu.memory_space<vmem>>, vector<1x1x13x13xf32>,
    %cst_94 = arith.constant 0.000000e+00 : f32
    %97 = vector.broadcast %cst_94 : f32 to vector<13x13xf32>
    %98 = arith.maximumf %69, %97 : vector<13x13xf32>
    %c0_95 = arith.constant 0 : index
    %c3_96 = arith.constant 3 : index
    %c0_97 = arith.constant 0 : index
    %c0_98 = arith.constant 0 : index
    %99 = vector.load %arg3[%c0_95, %c3_96, %c0_97, %c0_98] : memref<2x4x13x13xf32, #tpu.memory_space<vmem>>, vector<1x1x13x13xf32>
    %100 = vector.shape_cast %99 : vector<1x1x13x13xf32> to vector<13x13xf32>
    %101 = vector.shape_cast %98 : vector<13x13xf32> to vector<1x1x13x13xf32>
    tpu.vector_store %arg3[%c0_95, %c3_96, %c0_97, %c0_98], %101 {strides = array<i32>} : memref<2x4x13x13xf32, #tpu.memory_space<vmem>>, vector<1x1x13x13xf32>,
    %cst_99 = arith.constant 0.000000e+00 : f32
    %102 = vector.broadcast %cst_99 : f32 to vector<13x13xf32>
    %cst_100 = arith.constant 0.000000e+00 : f32
    %103 = vector.broadcast %cst_100 : f32 to vector<13x13xf32>
    %c1_101 = arith.constant 1 : index
    %c0_102 = arith.constant 0 : index
    %c0_103 = arith.constant 0 : index
    %c0_104 = arith.constant 0 : index
    %104 = vector.load %arg1[%c1_101, %c0_102, %c0_103, %c0_104] : memref<2x1x16x16xf32, #tpu.memory_space<vmem>>, vector<1x1x13x13xf32>
    %105 = vector.shape_cast %104 : vector<1x1x13x13xf32> to vector<13x13xf32>
    %106 = arith.subf %102, %105 : vector<13x13xf32>
    %107 = arith.subf %103, %105 : vector<13x13xf32>
    %c1_105 = arith.constant 1 : index
    %c0_106 = arith.constant 0 : index
    %c0_107 = arith.constant 0 : index
    %c1_108 = arith.constant 1 : index
    %108 = vector.load %arg1[%c1_105, %c0_106, %c0_107, %c1_108] : memref<2x1x16x16xf32, #tpu.memory_space<vmem>>, vector<1x1x13x13xf32>
    %109 = vector.shape_cast %108 : vector<1x1x13x13xf32> to vector<13x13xf32>
    %110 = arith.subf %106, %109 : vector<13x13xf32>
    %111 = arith.subf %107, %109 : vector<13x13xf32>
    %c1_109 = arith.constant 1 : index
    %c0_110 = arith.constant 0 : index
    %c0_111 = arith.constant 0 : index
    %c2_112 = arith.constant 2 : index
    %112 = vector.load %arg1[%c1_109, %c0_110, %c0_111, %c2_112] : memref<2x1x16x16xf32, #tpu.memory_space<vmem>>, vector<1x1x13x13xf32>
    %113 = vector.shape_cast %112 : vector<1x1x13x13xf32> to vector<13x13xf32>
    %114 = arith.addf %110, %113 : vector<13x13xf32>
    %115 = arith.subf %111, %113 : vector<13x13xf32>
    %c1_113 = arith.constant 1 : index
    %c0_114 = arith.constant 0 : index
    %c0_115 = arith.constant 0 : index
    %c3_116 = arith.constant 3 : index
    %116 = vector.load %arg1[%c1_113, %c0_114, %c0_115, %c3_116] : memref<2x1x16x16xf32, #tpu.memory_space<vmem>>, vector<1x1x13x13xf32>
    %117 = vector.shape_cast %116 : vector<1x1x13x13xf32> to vector<13x13xf32>
    %118 = arith.addf %114, %117 : vector<13x13xf32>
    %119 = arith.subf %115, %117 : vector<13x13xf32>
    %c1_117 = arith.constant 1 : index
    %c0_118 = arith.constant 0 : index
    %c1_119 = arith.constant 1 : index
    %c0_120 = arith.constant 0 : index
    %120 = vector.load %arg1[%c1_117, %c0_118, %c1_119, %c0_120] : memref<2x1x16x16xf32, #tpu.memory_space<vmem>>, vector<1x1x13x13xf32>
    %121 = vector.shape_cast %120 : vector<1x1x13x13xf32> to vector<13x13xf32>
    %122 = arith.subf %118, %121 : vector<13x13xf32>
    %123 = arith.subf %119, %121 : vector<13x13xf32>
    %c1_121 = arith.constant 1 : index
    %c0_122 = arith.constant 0 : index
    %c1_123 = arith.constant 1 : index
    %c1_124 = arith.constant 1 : index
    %124 = vector.load %arg1[%c1_121, %c0_122, %c1_123, %c1_124] : memref<2x1x16x16xf32, #tpu.memory_space<vmem>>, vector<1x1x13x13xf32>
    %125 = vector.shape_cast %124 : vector<1x1x13x13xf32> to vector<13x13xf32>
    %126 = arith.subf %122, %125 : vector<13x13xf32>
    %127 = arith.subf %123, %125 : vector<13x13xf32>
    %c1_125 = arith.constant 1 : index
    %c0_126 = arith.constant 0 : index
    %c1_127 = arith.constant 1 : index
    %c2_128 = arith.constant 2 : index
    %128 = vector.load %arg1[%c1_125, %c0_126, %c1_127, %c2_128] : memref<2x1x16x16xf32, #tpu.memory_space<vmem>>, vector<1x1x13x13xf32>
    %129 = vector.shape_cast %128 : vector<1x1x13x13xf32> to vector<13x13xf32>
    %130 = arith.addf %126, %129 : vector<13x13xf32>
    %131 = arith.subf %127, %129 : vector<13x13xf32>
    %c1_129 = arith.constant 1 : index
    %c0_130 = arith.constant 0 : index
    %c1_131 = arith.constant 1 : index
    %c3_132 = arith.constant 3 : index
    %132 = vector.load %arg1[%c1_129, %c0_130, %c1_131, %c3_132] : memref<2x1x16x16xf32, #tpu.memory_space<vmem>>, vector<1x1x13x13xf32>
    %133 = vector.shape_cast %132 : vector<1x1x13x13xf32> to vector<13x13xf32>
    %134 = arith.addf %130, %133 : vector<13x13xf32>
    %135 = arith.subf %131, %133 : vector<13x13xf32>
    %c1_133 = arith.constant 1 : index
    %c0_134 = arith.constant 0 : index
    %c2_135 = arith.constant 2 : index
    %c0_136 = arith.constant 0 : index
    %136 = vector.load %arg1[%c1_133, %c0_134, %c2_135, %c0_136] : memref<2x1x16x16xf32, #tpu.memory_space<vmem>>, vector<1x1x13x13xf32>
    %137 = vector.shape_cast %136 : vector<1x1x13x13xf32> to vector<13x13xf32>
    %138 = arith.subf %134, %137 : vector<13x13xf32>
    %139 = arith.addf %135, %137 : vector<13x13xf32>
    %c1_137 = arith.constant 1 : index
    %c0_138 = arith.constant 0 : index
    %c2_139 = arith.constant 2 : index
    %c1_140 = arith.constant 1 : index
    %140 = vector.load %arg1[%c1_137, %c0_138, %c2_139, %c1_140] : memref<2x1x16x16xf32, #tpu.memory_space<vmem>>, vector<1x1x13x13xf32>
    %141 = vector.shape_cast %140 : vector<1x1x13x13xf32> to vector<13x13xf32>
    %142 = arith.subf %138, %141 : vector<13x13xf32>
    %143 = arith.addf %139, %141 : vector<13x13xf32>
    %c1_141 = arith.constant 1 : index
    %c0_142 = arith.constant 0 : index
    %c2_143 = arith.constant 2 : index
    %c2_144 = arith.constant 2 : index
    %144 = vector.load %arg1[%c1_141, %c0_142, %c2_143, %c2_144] : memref<2x1x16x16xf32, #tpu.memory_space<vmem>>, vector<1x1x13x13xf32>
    %145 = vector.shape_cast %144 : vector<1x1x13x13xf32> to vector<13x13xf32>
    %146 = arith.addf %142, %145 : vector<13x13xf32>
    %147 = arith.addf %143, %145 : vector<13x13xf32>
    %c1_145 = arith.constant 1 : index
    %c0_146 = arith.constant 0 : index
    %c2_147 = arith.constant 2 : index
    %c3_148 = arith.constant 3 : index
    %148 = vector.load %arg1[%c1_145, %c0_146, %c2_147, %c3_148] : memref<2x1x16x16xf32, #tpu.memory_space<vmem>>, vector<1x1x13x13xf32>
    %149 = vector.shape_cast %148 : vector<1x1x13x13xf32> to vector<13x13xf32>
    %150 = arith.addf %146, %149 : vector<13x13xf32>
    %151 = arith.addf %147, %149 : vector<13x13xf32>
    %c1_149 = arith.constant 1 : index
    %c0_150 = arith.constant 0 : index
    %c3_151 = arith.constant 3 : index
    %c0_152 = arith.constant 0 : index
    %152 = vector.load %arg1[%c1_149, %c0_150, %c3_151, %c0_152] : memref<2x1x16x16xf32, #tpu.memory_space<vmem>>, vector<1x1x13x13xf32>
    %153 = vector.shape_cast %152 : vector<1x1x13x13xf32> to vector<13x13xf32>
    %154 = arith.subf %150, %153 : vector<13x13xf32>
    %155 = arith.addf %151, %153 : vector<13x13xf32>
    %c1_153 = arith.constant 1 : index
    %c0_154 = arith.constant 0 : index
    %c3_155 = arith.constant 3 : index
    %c1_156 = arith.constant 1 : index
    %156 = vector.load %arg1[%c1_153, %c0_154, %c3_155, %c1_156] : memref<2x1x16x16xf32, #tpu.memory_space<vmem>>, vector<1x1x13x13xf32>
    %157 = vector.shape_cast %156 : vector<1x1x13x13xf32> to vector<13x13xf32>
    %158 = arith.subf %154, %157 : vector<13x13xf32>
    %159 = arith.addf %155, %157 : vector<13x13xf32>
    %c1_157 = arith.constant 1 : index
    %c0_158 = arith.constant 0 : index
    %c3_159 = arith.constant 3 : index
    %c2_160 = arith.constant 2 : index
    %160 = vector.load %arg1[%c1_157, %c0_158, %c3_159, %c2_160] : memref<2x1x16x16xf32, #tpu.memory_space<vmem>>, vector<1x1x13x13xf32>
    %161 = vector.shape_cast %160 : vector<1x1x13x13xf32> to vector<13x13xf32>
    %162 = arith.addf %158, %161 : vector<13x13xf32>
    %163 = arith.addf %159, %161 : vector<13x13xf32>
    %c1_161 = arith.constant 1 : index
    %c0_162 = arith.constant 0 : index
    %c3_163 = arith.constant 3 : index
    %c3_164 = arith.constant 3 : index
    %164 = vector.load %arg1[%c1_161, %c0_162, %c3_163, %c3_164] : memref<2x1x16x16xf32, #tpu.memory_space<vmem>>, vector<1x1x13x13xf32>
    %165 = vector.shape_cast %164 : vector<1x1x13x13xf32> to vector<13x13xf32>
    %166 = arith.addf %162, %165 : vector<13x13xf32>
    %167 = arith.addf %163, %165 : vector<13x13xf32>
    %cst_165 = arith.constant 0.000000e+00 : f32
    %168 = vector.broadcast %cst_165 : f32 to vector<13x13xf32>
    %169 = arith.subf %168, %166 : vector<13x13xf32>
    %cst_166 = arith.constant 0.000000e+00 : f32
    %170 = vector.broadcast %cst_166 : f32 to vector<13x13xf32>
    %171 = arith.subf %170, %167 : vector<13x13xf32>
    %c1_167 = arith.constant 1 : index
    %c0_168 = arith.constant 0 : index
    %c0_169 = arith.constant 0 : index
    %c0_170 = arith.constant 0 : index
    %172 = vector.load %arg2[%c1_167, %c0_168, %c0_169, %c0_170] : memref<2x4x13x13xf32, #tpu.memory_space<vmem>>, vector<1x1x13x13xf32>
    %173 = vector.shape_cast %172 : vector<1x1x13x13xf32> to vector<13x13xf32>
    %174 = vector.shape_cast %166 : vector<13x13xf32> to vector<1x1x13x13xf32>
    tpu.vector_store %arg2[%c1_167, %c0_168, %c0_169, %c0_170], %174 {strides = array<i32>} : memref<2x4x13x13xf32, #tpu.memory_space<vmem>>, vector<1x1x13x13xf32>,
    %c1_171 = arith.constant 1 : index
    %c1_172 = arith.constant 1 : index
    %c0_173 = arith.constant 0 : index
    %c0_174 = arith.constant 0 : index
    %175 = vector.load %arg2[%c1_171, %c1_172, %c0_173, %c0_174] : memref<2x4x13x13xf32, #tpu.memory_space<vmem>>, vector<1x1x13x13xf32>
    %176 = vector.shape_cast %175 : vector<1x1x13x13xf32> to vector<13x13xf32>
    %177 = vector.shape_cast %169 : vector<13x13xf32> to vector<1x1x13x13xf32>
    tpu.vector_store %arg2[%c1_171, %c1_172, %c0_173, %c0_174], %177 {strides = array<i32>} : memref<2x4x13x13xf32, #tpu.memory_space<vmem>>, vector<1x1x13x13xf32>,
    %c1_175 = arith.constant 1 : index
    %c2_176 = arith.constant 2 : index
    %c0_177 = arith.constant 0 : index
    %c0_178 = arith.constant 0 : index
    %178 = vector.load %arg2[%c1_175, %c2_176, %c0_177, %c0_178] : memref<2x4x13x13xf32, #tpu.memory_space<vmem>>, vector<1x1x13x13xf32>
    %179 = vector.shape_cast %178 : vector<1x1x13x13xf32> to vector<13x13xf32>
    %180 = vector.shape_cast %167 : vector<13x13xf32> to vector<1x1x13x13xf32>
    tpu.vector_store %arg2[%c1_175, %c2_176, %c0_177, %c0_178], %180 {strides = array<i32>} : memref<2x4x13x13xf32, #tpu.memory_space<vmem>>, vector<1x1x13x13xf32>,
    %c1_179 = arith.constant 1 : index
    %c3_180 = arith.constant 3 : index
    %c0_181 = arith.constant 0 : index
    %c0_182 = arith.constant 0 : index
    %181 = vector.load %arg2[%c1_179, %c3_180, %c0_181, %c0_182] : memref<2x4x13x13xf32, #tpu.memory_space<vmem>>, vector<1x1x13x13xf32>
    %182 = vector.shape_cast %181 : vector<1x1x13x13xf32> to vector<13x13xf32>
    %183 = vector.shape_cast %171 : vector<13x13xf32> to vector<1x1x13x13xf32>
    tpu.vector_store %arg2[%c1_179, %c3_180, %c0_181, %c0_182], %183 {strides = array<i32>} : memref<2x4x13x13xf32, #tpu.memory_space<vmem>>, vector<1x1x13x13xf32>,
    %cst_183 = arith.constant 0.000000e+00 : f32
    %184 = vector.broadcast %cst_183 : f32 to vector<13x13xf32>
    %185 = arith.maximumf %166, %184 : vector<13x13xf32>
    %c1_184 = arith.constant 1 : index
    %c0_185 = arith.constant 0 : index
    %c0_186 = arith.constant 0 : index
    %c0_187 = arith.constant 0 : index
    %186 = vector.load %arg3[%c1_184, %c0_185, %c0_186, %c0_187] : memref<2x4x13x13xf32, #tpu.memory_space<vmem>>, vector<1x1x13x13xf32>
    %187 = vector.shape_cast %186 : vector<1x1x13x13xf32> to vector<13x13xf32>
    %188 = vector.shape_cast %185 : vector<13x13xf32> to vector<1x1x13x13xf32>
    tpu.vector_store %arg3[%c1_184, %c0_185, %c0_186, %c0_187], %188 {strides = array<i32>} : memref<2x4x13x13xf32, #tpu.memory_space<vmem>>, vector<1x1x13x13xf32>,
    %cst_188 = arith.constant 0.000000e+00 : f32
    %189 = vector.broadcast %cst_188 : f32 to vector<13x13xf32>
    %190 = arith.maximumf %169, %189 : vector<13x13xf32>
    %c1_189 = arith.constant 1 : index
    %c1_190 = arith.constant 1 : index
    %c0_191 = arith.constant 0 : index
    %c0_192 = arith.constant 0 : index
    %191 = vector.load %arg3[%c1_189, %c1_190, %c0_191, %c0_192] : memref<2x4x13x13xf32, #tpu.memory_space<vmem>>, vector<1x1x13x13xf32>
    %192 = vector.shape_cast %191 : vector<1x1x13x13xf32> to vector<13x13xf32>
    %193 = vector.shape_cast %190 : vector<13x13xf32> to vector<1x1x13x13xf32>
    tpu.vector_store %arg3[%c1_189, %c1_190, %c0_191, %c0_192], %193 {strides = array<i32>} : memref<2x4x13x13xf32, #tpu.memory_space<vmem>>, vector<1x1x13x13xf32>,
    %cst_193 = arith.constant 0.000000e+00 : f32
    %194 = vector.broadcast %cst_193 : f32 to vector<13x13xf32>
    %195 = arith.maximumf %167, %194 : vector<13x13xf32>
    %c1_194 = arith.constant 1 : index
    %c2_195 = arith.constant 2 : index
    %c0_196 = arith.constant 0 : index
    %c0_197 = arith.constant 0 : index
    %196 = vector.load %arg3[%c1_194, %c2_195, %c0_196, %c0_197] : memref<2x4x13x13xf32, #tpu.memory_space<vmem>>, vector<1x1x13x13xf32>
    %197 = vector.shape_cast %196 : vector<1x1x13x13xf32> to vector<13x13xf32>
    %198 = vector.shape_cast %195 : vector<13x13xf32> to vector<1x1x13x13xf32>
    tpu.vector_store %arg3[%c1_194, %c2_195, %c0_196, %c0_197], %198 {strides = array<i32>} : memref<2x4x13x13xf32, #tpu.memory_space<vmem>>, vector<1x1x13x13xf32>,
    %cst_198 = arith.constant 0.000000e+00 : f32
    %199 = vector.broadcast %cst_198 : f32 to vector<13x13xf32>
    %200 = arith.maximumf %171, %199 : vector<13x13xf32>
    %c1_199 = arith.constant 1 : index
    %c3_200 = arith.constant 3 : index
    %c0_201 = arith.constant 0 : index
    %c0_202 = arith.constant 0 : index
    %201 = vector.load %arg3[%c1_199, %c3_200, %c0_201, %c0_202] : memref<2x4x13x13xf32, #tpu.memory_space<vmem>>, vector<1x1x13x13xf32>
    %202 = vector.shape_cast %201 : vector<1x1x13x13xf32> to vector<13x13xf32>
    %203 = vector.shape_cast %200 : vector<13x13xf32> to vector<1x1x13x13xf32>
    tpu.vector_store %arg3[%c1_199, %c3_200, %c0_201, %c0_202], %203 {strides = array<i32>} : memref<2x4x13x13xf32, #tpu.memory_space<vmem>>, vector<1x1x13x13xf32>,
    return
  }
  func.func @transform_0(%arg0: i32) -> (i32, i32, i32, i32) {
    %c0_i32 = arith.constant 0 : i32
    %c0_i32_0 = arith.constant 0 : i32
    %c0_i32_1 = arith.constant 0 : i32
    %c0_i32_2 = arith.constant 0 : i32
    %c0_i32_3 = arith.constant 0 : i32
    return %c0_i32, %c0_i32_0, %c0_i32_1, %c0_i32_2 : i32, i32, i32, i32
  }
  func.func @transform_1(%arg0: i32) -> (i32, i32, i32, i32) {
    %c0_i32 = arith.constant 0 : i32
    %c0_i32_0 = arith.constant 0 : i32
    %c0_i32_1 = arith.constant 0 : i32
    %c0_i32_2 = arith.constant 0 : i32
    %c0_i32_3 = arith.constant 0 : i32
    return %c0_i32, %c0_i32_0, %c0_i32_1, %c0_i32_2 : i32, i32, i32, i32
  }
  func.func @transform_2(%arg0: i32) -> (i32, i32, i32, i32) {
    %c0_i32 = arith.constant 0 : i32
    %c0_i32_0 = arith.constant 0 : i32
    %c0_i32_1 = arith.constant 0 : i32
    %c0_i32_2 = arith.constant 0 : i32
    %c0_i32_3 = arith.constant 0 : i32
    return %c0_i32, %c0_i32_0, %c0_i32_1, %c0_i32_2 : i32, i32, i32, i32
  }
}

</mosaic_0001>

<bundles_post_ra>
// kernel: tpu_custom_call.1
= control target key start
LH: loop header
LB: loop body
LE: loop exit
PB: predicated region body
PF: predicated region fallthrough
CT: control target
= control target key end

     0   :  { %8 = vsyncpa [#allocation3], 0  ;;  %s460_s9 = smov [#allocation2]   ;;  %s833_s0 = inlined_call_operand.hbm [shape: f32[2,1,16,16], index: 0, kind: input, shape index: {}]   ;;  %s834_s1 = inlined_call_operand.vmem [shape: f32[2,4,13,13], index: 1, kind: output, shape index: {0}]   ;;  %s835_s2 = inlined_call_operand.vmem [shape: f32[2,4,13,13], index: 2, kind: output, shape index: {1}]  }
   0x1   :  { %s14_s10 = sshll.u32 %s460_s9, 4  ;;  %s436_s13 = scalar_lea.hbm %s833_s0, 512  ;;  %s15_s10 = int_to_ptr.vmem [resolvable:$true] %s14_s10 }
   0x2   :  { %p437_p0 = scmp.ne.s32.totalorder %s833_s0, %s436_s13  ;;  %p440_p1 = scmp.lt.u32.totalorder %s436_s13, %s833_s0 }
   0x4   :  { %p442_p2 = pnand %p440_p1, %p437_p0 }
   0x6   :  { %445 = shalt.err (!%p442_p2)
}
   0x7   :  { %s446_s18 = scalar_lea.vmem %s15_s10, 512  ;;  %p451_p4 = scmp.lt.s32.totalorder %s15_s10, %s15_s10 }
   0x8   :  { %p447_p3 = scmp.ne.s32.totalorder %s15_s10, %s446_s18  ;;  %p452_p5 = scmp.lt.s32.totalorder %s446_s18, %s446_s18 }
   0xa   :  { %p453_p6 = por %p452_p5, %p451_p4 }
   0xc   :  { %p454_p7 = pnand %p453_p6, %p447_p3 }
   0xe   :  { %457 = shalt.err (!%p454_p7)
}
   0xf   :  { %s461_s19 = smov 128   ;;  %s462_s20 = smov 8  }
  0x10   :  { %20 = dma.hbm_to_vmem [thread:$0]  %s833_s0, 512, %s15_s10, [#allocation3], %s461_s19, %s461_s19, %s462_s20  }
  0x11   :  { %458 = dma.done.wait [#allocation3], 512  }
  0x12   :  { %459 = vsyncadd [#allocation3], 4294966784  ;;  %v493_v0 = vld [vmem:[#allocation2 + $0x10] sm:$0xff]  ;;  %v495_v1 = vld [vmem:[#allocation2] sm:$0xff]  ;;  %s463_s23 = smov 127   ;;  %s464_s0 = smov 126  }
  0x13   :  { %215 = vrot.lane.b32.xlu1 %v493_v0, %s463_s23  ;;  %30 = vrot.lane.b32.xlu0 %v495_v1, %s463_s23  ;;  %v501_v2 = vld [vmem:[#allocation2 + $0x18] sm:$0x1f]  ;;  %v503_v3 = vld [vmem:[#allocation2 + $0x8] sm:$0x1f]  ;;  %s465_s24 = smov 125   ;;  %v211_v16 = vsub.f32 0.0, %v493_v0 }
  0x14   :  { %v525_v4 = vld [vmem:[#allocation2 + $0x9] sm:$0x1f]  ;;  %v527_v5 = vld [vmem:[#allocation2 + $0x1] sm:$0xff]  ;;  %v533_v6 = vld [vmem:[#allocation2 + $0x19] sm:$0x1f]  ;;  %v26_v44 = vsub.f32 0.0, %v495_v1 }
  0x15   :  { %v535_v7 = vld [vmem:[#allocation2 + $0x11] sm:$0xff]  ;;  %v557_v8 = vld [vmem:[#allocation2 + $0xa] sm:$0x1f]  ;;  %v559_v9 = vld [vmem:[#allocation2 + $0x2] sm:$0xff]  ;;  %v27_v45 = vsub.f32 0.0, %v503_v3  ;;  %v212_v48 = vsub.f32 0.0, %v501_v2 }
  0x16   :  { %v565_v10 = vld [vmem:[#allocation2 + $0x1a] sm:$0x1f]  ;;  %v567_v11 = vld [vmem:[#allocation2 + $0x12] sm:$0xff]  ;;  %v589_v12 = vld [vmem:[#allocation2 + $0xb] sm:$0x1f]  ;;  %vm178_vm0 = vcmask 102400  }
  0x17   :  { %217 = vrot.lane.b32.xlu1 %v501_v2, %s463_s23  ;;  %32 = vrot.lane.b32.xlu0 %v503_v3, %s463_s23  ;;  %v591_v13 = vld [vmem:[#allocation2 + $0x3] sm:$0xff]  ;;  %v597_v14 = vld [vmem:[#allocation2 + $0x1b] sm:$0x1f]  ;;  %v599_v15 = vld [vmem:[#allocation2 + $0x13] sm:$0xff]  ;;  %vm176_vm1 = vcmask 105472  }
  0x1b   :  { %40 = vrot.lane.b32.xlu1 %v503_v3, %s464_s0  ;;  %38 = vrot.lane.b32.xlu0 %v495_v1, %s464_s0 }
  0x1f   :  { %225 = vrot.lane.b32.xlu1 %v501_v2, %s464_s0  ;;  %223 = vrot.lane.b32.xlu0 %v493_v0, %s464_s0 }
  0x23   :  { %50 = vrot.lane.b32.xlu1 %v503_v3, %s465_s24  ;;  %48 = vrot.lane.b32.xlu0 %v495_v1, %s465_s24 }
  0x27   :  { %235 = vrot.lane.b32.xlu1 %v501_v2, %s465_s24  ;;  %233 = vrot.lane.b32.xlu0 %v493_v0, %s465_s24 }
  0x2b   :  { %68 = vrot.lane.b32.xlu1 %v525_v4, %s463_s23  ;;  %66 = vrot.lane.b32.xlu0 %v527_v5, %s463_s23 }
  0x2f   :  { %253 = vrot.lane.b32.xlu1 %v533_v6, %s463_s23  ;;  %251 = vrot.lane.b32.xlu0 %v535_v7, %s463_s23 }
  0x33   :  { %78 = vrot.lane.b32.xlu1 %v525_v4, %s464_s0  ;;  %76 = vrot.lane.b32.xlu0 %v527_v5, %s464_s0 }
  0x37   :  { %263 = vrot.lane.b32.xlu1 %v533_v6, %s464_s0  ;;  %261 = vrot.lane.b32.xlu0 %v535_v7, %s464_s0 }
  0x3b   :  { %88 = vrot.lane.b32.xlu1 %v525_v4, %s465_s24  ;;  %86 = vrot.lane.b32.xlu0 %v527_v5, %s465_s24 }
  0x3f   :  { %273 = vrot.lane.b32.xlu1 %v533_v6, %s465_s24  ;;  %271 = vrot.lane.b32.xlu0 %v535_v7, %s465_s24 }
  0x43   :  { %106 = vrot.lane.b32.xlu1 %v557_v8, %s463_s23  ;;  %104 = vrot.lane.b32.xlu0 %v559_v9, %s463_s23 }
  0x47   :  { %291 = vrot.lane.b32.xlu1 %v565_v10, %s463_s23  ;;  %289 = vrot.lane.b32.xlu0 %v567_v11, %s463_s23 }
  0x4b   :  { %116 = vrot.lane.b32.xlu1 %v557_v8, %s464_s0  ;;  %114 = vrot.lane.b32.xlu0 %v559_v9, %s464_s0 }
  0x4f   :  { %301 = vrot.lane.b32.xlu1 %v565_v10, %s464_s0  ;;  %299 = vrot.lane.b32.xlu0 %v567_v11, %s464_s0 }
  0x53   :  { %126 = vrot.lane.b32.xlu1 %v557_v8, %s465_s24  ;;  %124 = vrot.lane.b32.xlu0 %v559_v9, %s465_s24 }
  0x57   :  { %311 = vrot.lane.b32.xlu1 %v565_v10, %s465_s24  ;;  %309 = vrot.lane.b32.xlu0 %v567_v11, %s465_s24 }
  0x5b   :  { %144 = vrot.lane.b32.xlu1 %v589_v12, %s463_s23  ;;  %142 = vrot.lane.b32.xlu0 %v591_v13, %s463_s23 }
  0x5f   :  { %329 = vrot.lane.b32.xlu1 %v597_v14, %s463_s23  ;;  %327 = vrot.lane.b32.xlu0 %v599_v15, %s463_s23 }
  0x63   :  { %154 = vrot.lane.b32.xlu1 %v589_v12, %s464_s0  ;;  %152 = vrot.lane.b32.xlu0 %v591_v13, %s464_s0 }
  0x67   :  { %339 = vrot.lane.b32.xlu1 %v597_v14, %s464_s0  ;;  %337 = vrot.lane.b32.xlu0 %v599_v15, %s464_s0 }
  0x6b   :  { %164 = vrot.lane.b32.xlu1 %v589_v12, %s465_s24  ;;  %162 = vrot.lane.b32.xlu0 %v591_v13, %s465_s24 }
  0x6f   :  { %349 = vrot.lane.b32.xlu1 %v597_v14, %s465_s24  ;;  %347 = vrot.lane.b32.xlu0 %v599_v15, %s465_s24 }
  0x85   :  { %v216_v17 = vpop.permute.xlu1 %215  ;;  %v31_v18 = vpop.permute.xlu0 %30 }
  0x86   :  { %v221_v19 = vsub.f32 %v211_v16, %v216_v17  ;;  %v36_v49 = vsub.f32 %v26_v44, %v31_v18 }
  0x89   :  { %v218_v20 = vpop.permute.xlu1 %217  ;;  %v33_v21 = vpop.permute.xlu0 %32 }
  0x8a   :  { %v37_v50 = vsub.f32 %v27_v45, %v33_v21  ;;  %v222_v57 = vsub.f32 %v212_v48, %v218_v20 }
  0x8d   :  { %v41_v22 = vpop.permute.xlu1 %40  ;;  %v39_v23 = vpop.permute.xlu0 %38 }
  0x8e   :  { %v45_v53 = vadd.f32 %v41_v22, %v37_v50  ;;  %v47_v54 = vsub.f32 %v37_v50, %v41_v22  ;;  %v44_v55 = vadd.f32 %v39_v23, %v36_v49  ;;  %v46_v56 = vsub.f32 %v36_v49, %v39_v23 }
  0x91   :  { %v226_v24 = vpop.permute.xlu1 %225  ;;  %v224_v25 = vpop.permute.xlu0 %223 }
  0x92   :  { %v230_v62 = vadd.f32 %v226_v24, %v222_v57  ;;  %v232_v63 = vsub.f32 %v222_v57, %v226_v24  ;;  %v229_v0 = vadd.f32 %v224_v25, %v221_v19  ;;  %v231_v1 = vsub.f32 %v221_v19, %v224_v25 }
  0x95   :  { %v51_v26 = vpop.permute.xlu1 %50  ;;  %v49_v27 = vpop.permute.xlu0 %48 }
  0x96   :  { %v55_v58 = vadd.f32 %v51_v26, %v45_v53  ;;  %v57_v59 = vsub.f32 %v47_v54, %v51_v26  ;;  %v54_v60 = vadd.f32 %v49_v27, %v44_v55  ;;  %v56_v61 = vsub.f32 %v46_v56, %v49_v27 }
  0x98   :  { %v61_v22 = vsub.f32 %v55_v58, %v525_v4  ;;  %v63_v20 = vsub.f32 %v57_v59, %v525_v4  ;;  %v60_v23 = vsub.f32 %v54_v60, %v527_v5  ;;  %v62_v26 = vsub.f32 %v56_v61, %v527_v5 }
  0x99   :  { %v236_v28 = vpop.permute.xlu1 %235  ;;  %v234_v29 = vpop.permute.xlu0 %233 }
  0x9a   :  { %v240_v16 = vadd.f32 %v236_v28, %v230_v62  ;;  %v242_v17 = vsub.f32 %v232_v63, %v236_v28  ;;  %v239_v18 = vadd.f32 %v234_v29, %v229_v0  ;;  %v241_v21 = vsub.f32 %v231_v1, %v234_v29 }
  0x9c   :  { %v246_v48 = vsub.f32 %v240_v16, %v533_v6  ;;  %v248_v28 = vsub.f32 %v242_v17, %v533_v6  ;;  %v245_v29 = vsub.f32 %v239_v18, %v535_v7  ;;  %v247_v49 = vsub.f32 %v241_v21, %v535_v7 }
  0x9d   :  { %v69_v30 = vpop.permute.xlu1 %68  ;;  %v67_v31 = vpop.permute.xlu0 %66 }
  0x9e   :  { %v73_v44 = vsub.f32 %v61_v22, %v69_v30  ;;  %v75_v19 = vsub.f32 %v63_v20, %v69_v30  ;;  %v72_v25 = vsub.f32 %v60_v23, %v67_v31  ;;  %v74_v45 = vsub.f32 %v62_v26, %v67_v31 }
  0xa1   :  { %v254_v32 = vpop.permute.xlu1 %253  ;;  %v252_v33 = vpop.permute.xlu0 %251 }
  0xa2   :  { %v258_v54 = vsub.f32 %v246_v48, %v254_v32  ;;  %v260_v30 = vsub.f32 %v248_v28, %v254_v32  ;;  %v257_v55 = vsub.f32 %v245_v29, %v252_v33  ;;  %v259_v31 = vsub.f32 %v247_v49, %v252_v33 }
  0xa5   :  { %v622_v34 = vpop.permute.xlu1 %78  ;;  %v624_v35 = vpop.permute.xlu0 %76 }
  0xa6   :  { %v83_v4 = vadd.f32 %v622_v34, %v73_v44  ;;  %v85_v50 = vsub.f32 %v75_v19, %v622_v34  ;;  %v82_v5 = vadd.f32 %v624_v35, %v72_v25  ;;  %v84_v53 = vsub.f32 %v74_v45, %v624_v35 }
  0xa9   :  { %v626_v36 = vpop.permute.xlu1 %263  ;;  %v628_v37 = vpop.permute.xlu0 %261 }
  0xaa   :  { %v268_v7 = vadd.f32 %v626_v36, %v258_v54  ;;  %v270_v61 = vsub.f32 %v260_v30, %v626_v36  ;;  %v267_v34 = vadd.f32 %v628_v37, %v257_v55  ;;  %v269_v62 = vsub.f32 %v259_v31, %v628_v37 }
  0xad   :  { %v89_v38 = vpop.permute.xlu1 %88  ;;  %v87_v39 = vpop.permute.xlu0 %86 }
  0xae   :  { %v93_v58 = vadd.f32 %v89_v38, %v83_v4  ;;  %v95_v6 = vsub.f32 %v85_v50, %v89_v38  ;;  %v92_v59 = vadd.f32 %v87_v39, %v82_v5  ;;  %v94_v60 = vsub.f32 %v84_v53, %v87_v39 }
  0xb0   :  { %v99_v39 = vsub.f32 %v93_v58, %v557_v8  ;;  %v101_v1 = vadd.f32 %v557_v8, %v95_v6  ;;  %v98_v36 = vsub.f32 %v92_v59, %v559_v9  ;;  %v100_v16 = vadd.f32 %v559_v9, %v94_v60 }
  0xb1   :  { %v630_v40 = vpop.permute.xlu1 %273  ;;  %v632_v41 = vpop.permute.xlu0 %271 }
  0xb2   :  { %v278_v35 = vadd.f32 %v630_v40, %v268_v7  ;;  %v280_v32 = vsub.f32 %v270_v61, %v630_v40  ;;  %v277_v33 = vadd.f32 %v632_v41, %v267_v34  ;;  %v279_v63 = vsub.f32 %v269_v62, %v632_v41 }
  0xb4   :  { %v284_v41 = vsub.f32 %v278_v35, %v565_v10  ;;  %v286_v21 = vadd.f32 %v565_v10, %v280_v32  ;;  %v283_v22 = vsub.f32 %v277_v33, %v567_v11  ;;  %v285_v8 = vadd.f32 %v567_v11, %v279_v63 }
  0xb5   :  { %v634_v42 = vpop.permute.xlu1 %106  ;;  %v636_v43 = vpop.permute.xlu0 %104 }
  0xb6   :  { %v111_v37 = vsub.f32 %v99_v39, %v634_v42  ;;  %v113_v17 = vadd.f32 %v634_v42, %v101_v1  ;;  %v110_v40 = vsub.f32 %v98_v36, %v636_v43  ;;  %v112_v18 = vadd.f32 %v636_v43, %v100_v16 }
  0xb9   :  { %v640_v46 = vpop.permute.xlu1 %291  ;;  %v642_v47 = vpop.permute.xlu0 %289 }
  0xba   :  { %v296_v43 = vsub.f32 %v284_v41, %v640_v46  ;;  %v298_v19 = vadd.f32 %v640_v46, %v286_v21  ;;  %v295_v10 = vsub.f32 %v283_v22, %v642_v47  ;;  %v297_v25 = vadd.f32 %v642_v47, %v285_v8 }
  0xbd   :  { %v645_v51 = vpop.permute.xlu1 %116  ;;  %v647_v52 = vpop.permute.xlu0 %114 }
  0xbe   :  { %v121_v9 = vadd.f32 %v645_v51, %v111_v37  ;;  %v123_v26 = vadd.f32 %v645_v51, %v113_v17  ;;  %v120_v42 = vadd.f32 %v647_v52, %v110_v40  ;;  %v122_v44 = vadd.f32 %v647_v52, %v112_v18 }
  0xc1   :  { %v649_v2 = vpop.permute.xlu1 %301  ;;  %v651_v3 = vpop.permute.xlu0 %299 }
  0xc2   :  { %v306_v29 = vadd.f32 %v649_v2, %v296_v43  ;;  %v308_v51 = vadd.f32 %v649_v2, %v298_v19  ;;  %v305_v49 = vadd.f32 %v651_v3, %v295_v10  ;;  %v307_v52 = vadd.f32 %v651_v3, %v297_v25 }
  0xc5   :  { %v127_v27 = vpop.permute.xlu1 %126  ;;  %v125_v24 = vpop.permute.xlu0 %124 }
  0xc6   :  { %v131_v45 = vadd.f32 %v127_v27, %v121_v9  ;;  %v133_v11 = vadd.f32 %v127_v27, %v123_v26  ;;  %v130_v48 = vadd.f32 %v125_v24, %v120_v42  ;;  %v132_v28 = vadd.f32 %v125_v24, %v122_v44 }
  0xc8   :  { %v137_v47 = vsub.f32 %v131_v45, %v589_v12  ;;  %v139_v27 = vadd.f32 %v589_v12, %v133_v11  ;;  %v136_v24 = vsub.f32 %v130_v48, %v591_v13  ;;  %v138_v30 = vadd.f32 %v591_v13, %v132_v28 }
  0xc9   :  { %v312_v56 = vpop.permute.xlu1 %311  ;;  %v310_v57 = vpop.permute.xlu0 %309 }
  0xca   :  { %v316_v5 = vadd.f32 %v312_v56, %v306_v29  ;;  %v318_v46 = vadd.f32 %v312_v56, %v308_v51  ;;  %v315_v53 = vadd.f32 %v310_v57, %v305_v49  ;;  %v317_v54 = vadd.f32 %v310_v57, %v307_v52 }
  0xcc   :  { %v322_v56 = vsub.f32 %v316_v5, %v597_v14  ;;  %v324_v57 = vadd.f32 %v597_v14, %v318_v46  ;;  %v321_v59 = vsub.f32 %v315_v53, %v599_v15  ;;  %v323_v12 = vadd.f32 %v599_v15, %v317_v54 }
  0xcd   :  { %v145_v0 = vpop.permute.xlu1 %144  ;;  %v143_v38 = vpop.permute.xlu0 %142 }
  0xce   :  { %v149_v31 = vsub.f32 %v137_v47, %v145_v0  ;;  %v151_v3 = vadd.f32 %v145_v0, %v139_v27  ;;  %v148_v58 = vsub.f32 %v136_v24, %v143_v38  ;;  %v150_v6 = vadd.f32 %v143_v38, %v138_v30 }
  0xd1   :  { %v330_v20 = vpop.permute.xlu1 %329  ;;  %v328_v23 = vpop.permute.xlu0 %327 }
  0xd2   :  { %v334_v34 = vsub.f32 %v322_v56, %v330_v20  ;;  %v336_v62 = vadd.f32 %v330_v20, %v324_v57  ;;  %v333_v35 = vsub.f32 %v321_v59, %v328_v23  ;;  %v335_v32 = vadd.f32 %v328_v23, %v323_v12 }
  0xd5   :  { %v155_v4 = vpop.permute.xlu1 %154  ;;  %v153_v50 = vpop.permute.xlu0 %152 }
  0xd6   :  { %v159_v60 = vadd.f32 %v155_v4, %v149_v31  ;;  %v161_v7 = vadd.f32 %v155_v4, %v151_v3  ;;  %v158_v61 = vadd.f32 %v153_v50, %v148_v58  ;;  %v160_v13 = vadd.f32 %v153_v50, %v150_v6 }
  0xd9   :  { %v340_v55 = vpop.permute.xlu1 %339  ;;  %v338_v2 = vpop.permute.xlu0 %337 }
  0xda   :  { %v344_v36 = vadd.f32 %v340_v55, %v334_v34  ;;  %v346_v14 = vadd.f32 %v340_v55, %v336_v62  ;;  %v343_v16 = vadd.f32 %v338_v2, %v333_v35  ;;  %v345_v37 = vadd.f32 %v338_v2, %v335_v32 }
  0xdd   :  { %v165_v33 = vpop.permute.xlu1 %164  ;;  %v163_v63 = vpop.permute.xlu0 %162 }
  0xde   :  { %v169_v0 = vadd.f32 %v165_v33, %v159_v60  ;;  %v171_v38 = vadd.f32 %v165_v33, %v161_v7  ;;  %v168_v39 = vadd.f32 %v163_v63, %v158_v61  ;;  %v170_v1 = vadd.f32 %v163_v63, %v160_v13 }
  0xe0   :  { %v173_v17 = vsub.f32 0.0, %v169_v0  ;;  %v175_v15 = vsub.f32 0.0, %v171_v38  ;;  %179 = vst.msk [vmem:[%s834_s1 + $0x8] sm:$0x1f] %vm178_vm0, %v169_v0  ;;  %405 = vst.msk [vmem:[%s834_s1 + $0x28] sm:$0x1f] %vm178_vm0, %v171_v38 }
  0xe1   :  { %v190_v40 = vmax.f32 %v169_v0, 0.0  ;;  %v199_v18 = vmax.f32 %v171_v38, 0.0  ;;  %177 = vst.msk [vmem:[%s834_s1] sm:$0xff] %vm176_vm1, %v168_v39  ;;  %404 = vst.msk [vmem:[%s834_s1 + $0x20] sm:$0xff] %vm176_vm1, %v170_v1  ;;  %v172_v41 = vsub.f32 0.0, %v168_v39  ;;  %v174_v21 = vsub.f32 0.0, %v170_v1  ;;  %v350_v20 = vpop.permute.xlu1 %349  ;;  %v348_v23 = vpop.permute.xlu0 %347 }
  0xe2   :  { %v189_v22 = vmax.f32 %v168_v39, 0.0  ;;  %v198_v8 = vmax.f32 %v170_v1, 0.0  ;;  %403 = vst.msk [vmem:[%s834_s1 + $0x18] sm:$0x1f] %vm178_vm0, %v173_v17  ;;  %407 = vst.msk [vmem:[%s834_s1 + $0x38] sm:$0x1f] %vm178_vm0, %v175_v15  ;;  %v354_v42 = vadd.f32 %v350_v20, %v344_v36  ;;  %v356_v44 = vadd.f32 %v350_v20, %v346_v14 }
  0xe3   :  { %192 = vst.msk [vmem:[%s835_s2 + $0x8] sm:$0x1f] %vm178_vm0, %v190_v40  ;;  %v194_v9 = vmax.f32 %v173_v17, 0.0  ;;  %411 = vst.msk [vmem:[%s835_s2 + $0x28] sm:$0x1f] %vm178_vm0, %v199_v18  ;;  %v204_v26 = vmax.f32 %v175_v15, 0.0  ;;  %v353_v10 = vadd.f32 %v348_v23, %v343_v16  ;;  %v355_v25 = vadd.f32 %v348_v23, %v345_v37 }
  0xe4   :  { %402 = vst.msk [vmem:[%s834_s1 + $0x10] sm:$0xff] %vm176_vm1, %v172_v41  ;;  %406 = vst.msk [vmem:[%s834_s1 + $0x30] sm:$0xff] %vm176_vm1, %v174_v21  ;;  %v193_v43 = vmax.f32 %v172_v41, 0.0  ;;  %v203_v19 = vmax.f32 %v174_v21, 0.0  ;;  %v358_v45 = vsub.f32 0.0, %v354_v42  ;;  %v360_v11 = vsub.f32 0.0, %v356_v44 }
  0xe5   :  { %191 = vst.msk [vmem:[%s835_s2] sm:$0xff] %vm176_vm1, %v189_v22  ;;  %410 = vst.msk [vmem:[%s835_s2 + $0x20] sm:$0xff] %vm176_vm1, %v198_v8  ;;  %v374_v48 = vmax.f32 %v354_v42, 0.0  ;;  %v384_v28 = vmax.f32 %v356_v44, 0.0  ;;  %v357_v29 = vsub.f32 0.0, %v353_v10  ;;  %v359_v51 = vsub.f32 0.0, %v355_v25 }
  0xe6   :  { %409 = vst.msk [vmem:[%s835_s2 + $0x18] sm:$0x1f] %vm178_vm0, %v194_v9  ;;  %413 = vst.msk [vmem:[%s835_s2 + $0x38] sm:$0x1f] %vm178_vm0, %v204_v26  ;;  %v373_v49 = vmax.f32 %v353_v10, 0.0  ;;  %v383_v52 = vmax.f32 %v355_v25, 0.0 }
  0xe7   :  { %415 = vst.msk [vmem:[%s834_s1 + $0x48] sm:$0x1f] %vm178_vm0, %v354_v42  ;;  %419 = vst.msk [vmem:[%s834_s1 + $0x68] sm:$0x1f] %vm178_vm0, %v356_v44  ;;  %v379_v4 = vmax.f32 %v358_v45, 0.0  ;;  %v389_v50 = vmax.f32 %v360_v11, 0.0 }
  0xe8   :  { %408 = vst.msk [vmem:[%s835_s2 + $0x10] sm:$0xff] %vm176_vm1, %v193_v43  ;;  %412 = vst.msk [vmem:[%s835_s2 + $0x30] sm:$0xff] %vm176_vm1, %v203_v19  ;;  %v378_v5 = vmax.f32 %v357_v29, 0.0  ;;  %v388_v46 = vmax.f32 %v359_v51, 0.0 }
  0xe9   :  { %414 = vst.msk [vmem:[%s834_s1 + $0x40] sm:$0xff] %vm176_vm1, %v353_v10  ;;  %418 = vst.msk [vmem:[%s834_s1 + $0x60] sm:$0xff] %vm176_vm1, %v355_v25 }
  0xea   :  { %417 = vst.msk [vmem:[%s834_s1 + $0x58] sm:$0x1f] %vm178_vm0, %v358_v45  ;;  %421 = vst.msk [vmem:[%s834_s1 + $0x78] sm:$0x1f] %vm178_vm0, %v360_v11 }
  0xeb   :  { %423 = vst.msk [vmem:[%s835_s2 + $0x48] sm:$0x1f] %vm178_vm0, %v374_v48  ;;  %427 = vst.msk [vmem:[%s835_s2 + $0x68] sm:$0x1f] %vm178_vm0, %v384_v28 }
  0xec   :  { %416 = vst.msk [vmem:[%s834_s1 + $0x50] sm:$0xff] %vm176_vm1, %v357_v29  ;;  %420 = vst.msk [vmem:[%s834_s1 + $0x70] sm:$0xff] %vm176_vm1, %v359_v51 }
  0xed   :  { %422 = vst.msk [vmem:[%s835_s2 + $0x40] sm:$0xff] %vm176_vm1, %v373_v49  ;;  %426 = vst.msk [vmem:[%s835_s2 + $0x60] sm:$0xff] %vm176_vm1, %v383_v52 }
  0xee   :  { %425 = vst.msk [vmem:[%s835_s2 + $0x58] sm:$0x1f] %vm178_vm0, %v379_v4  ;;  %429 = vst.msk [vmem:[%s835_s2 + $0x78] sm:$0x1f] %vm178_vm0, %v389_v50 }
  0xef   :  { %424 = vst.msk [vmem:[%s835_s2 + $0x50] sm:$0xff] %vm176_vm1, %v378_v5  ;;  %428 = vst.msk [vmem:[%s835_s2 + $0x70] sm:$0xff] %vm176_vm1, %v388_v46 }
  0xf0   :  { %401 = vsyncpa [#allocation3], 1 }

</bundles_post_ra>
